<compile_context>
chip_gen: v5e
topology: v5e:2x2
jax: 0.10.0
libtpu: 0.0.40
codegen_flags: <defaults>
</compile_context>

<pallas_src>
import jax
import jax.numpy as jnp
from jax.experimental import pallas as pl
from jax.experimental.pallas import tpu as pltpu


def _copy_kernel(x_ref, o_ref):
    # Pure lane-dense tile copy; no reshape inside the kernel.
    o_ref[...] = x_ref[...]


def _pick_tile(dim, candidates):
    """Largest candidate that evenly divides `dim`, else the full dim."""
    for c in candidates:
        if dim % c == 0:
            return c
    return dim  # full-extent block is always a legal block shape


def flat_forward(x: jax.Array) -> jax.Array:
    """Equivalent of torch `x.flatten(1)` for an N-D input (N >= 2)."""
    B = x.shape[0]
    flat_dim = 1
    for d in x.shape[1:]:
        flat_dim *= d

    # Metadata-only reshape in the wrapper: the kernel receives a lane-dense
    # (B, flat_dim) slab (flat_dim is a multiple of 128 for RelNet shapes).
    x2 = x.reshape(B, flat_dim)

    itemsize = jnp.dtype(x.dtype).itemsize
    # Sublane multiple for the second-to-last block dim (f32:8, bf16:16, i8:32).
    sublane = {4: 8, 2: 16, 1: 32}.get(itemsize, 8)

    # Row tile: a multiple of the sublane count, or the full batch dim.
    row_candidates = tuple(c for c in (256, 128, 64, 32, 16, 8) if c % sublane == 0)
    block_rows = _pick_tile(B, row_candidates)
    # Column tile: 512-2048 lanes (multiple of 128) for good pipelining,
    # falling back to the full flattened dim for small inputs.
    block_cols = _pick_tile(flat_dim, (2048, 1024, 512, 256, 128))

    grid = (B // block_rows if B % block_rows == 0 else 1,
            flat_dim // block_cols if flat_dim % block_cols == 0 else 1)

    block_bytes = block_rows * block_cols * itemsize
    # in + out blocks, double-buffered, plus headroom; keep under scoped caps
    # on every generation (<=32 MiB works for v5e/v6e/v7x).
    vmem_limit = int(min(32 << 20, max(8 << 20, 6 * block_bytes)))

    bytes_accessed = 2 * B * flat_dim * itemsize  # one HBM read + one write

    return pl.pallas_call(
        _copy_kernel,
        out_shape=jax.ShapeDtypeStruct((B, flat_dim), x.dtype),
        grid=grid,
        in_specs=[pl.BlockSpec((block_rows, block_cols), lambda i, j: (i, j))],
        out_specs=pl.BlockSpec((block_rows, block_cols), lambda i, j: (i, j)),
        compiler_params=pltpu.CompilerParams(
            dimension_semantics=("parallel", "parallel"),
            vmem_limit_bytes=vmem_limit,
        ),
        cost_estimate=pl.CostEstimate(
            flops=0, transcendentals=0, bytes_accessed=bytes_accessed
        ),
    )(x2)


if __name__ == "__main__":
    key = jax.random.PRNGKey(0)
    # Small shapes consistent with the module's forward: batch=2, C=4, 16x16.
    x = jax.random.normal(key, (2, 4, 16, 16), dtype=jnp.float32)

    y = flat_forward(x)
    jax.block_until_ready(y)

    # Correctness check against the plain-JAX reference (== torch flatten(1)).
    y_ref = x.reshape(x.shape[0], -1)
    assert y.shape == (2, 4 * 16 * 16), y.shape
    assert jnp.array_equal(y, y_ref), "mismatch vs reference flatten"

    print("KERNEL_OK")
</pallas_src>

<mosaic_0001>
module attributes {stable_mosaic.version = 11 : i64} {
  func.func @_copy_kernel(%arg0: i32, %arg1: i32, %arg2: memref<2x1024xf32, #tpu.memory_space<vmem>>, %arg3: memref<2x1024xf32, #tpu.memory_space<vmem>>) attributes {dimension_semantics = [#tpu.dimension_semantics<parallel>, #tpu.dimension_semantics<parallel>], iteration_bounds = array<i64: 1, 1>, scalar_prefetch = 0 : i64, scratch_operands = 0 : i64, tpu.core_type = #tpu.core_type<tc>, window_params = [{transform_indices = @transform_0, window_bounds = array<i64: 2, 1024>}, {transform_indices = @transform_1, window_bounds = array<i64: 2, 1024>}]} {
    %c0 = arith.constant 0 : index
    %c0_0 = arith.constant 0 : index
    %0 = vector.load %arg2[%c0, %c0_0] : memref<2x1024xf32, #tpu.memory_space<vmem>>, vector<2x1024xf32>
    %c0_1 = arith.constant 0 : index
    %c0_2 = arith.constant 0 : index
    %1 = vector.load %arg3[%c0_1, %c0_2] : memref<2x1024xf32, #tpu.memory_space<vmem>>, vector<2x1024xf32>
    tpu.vector_store %arg3[%c0_1, %c0_2], %0 {strides = array<i32>} : memref<2x1024xf32, #tpu.memory_space<vmem>>, vector<2x1024xf32>,
    return
  }
  func.func @transform_0(%arg0: i32, %arg1: i32) -> (i32, i32) {
    %c0_i32 = arith.constant 0 : i32
    return %arg0, %arg1 : i32, i32
  }
  func.func @transform_1(%arg0: i32, %arg1: i32) -> (i32, i32) {
    %c0_i32 = arith.constant 0 : i32
    return %arg0, %arg1 : i32, i32
  }
}

</mosaic_0001>

<bundles_post_ra>
// kernel: tpu_custom_call.1
= control target key start
LH: loop header
LB: loop body
LE: loop exit
PB: predicated region body
PF: predicated region fallthrough
CT: control target
= control target key end

     0   :  { %6 = vsyncpa [#allocation3], 0  ;;  %s116_s0 = inlined_call_operand.hbm [shape: f32[2,1024], index: 0, kind: input, shape index: {}]   ;;  %s117_s1 = inlined_call_operand.hbm [shape: f32[2,1024], index: 1, kind: output, shape index: {}]  }
   0x1   :  { %7 = vsyncpa [#allocation4], 0  ;;  %s13_s8 = sshll.u32 %s116_s0, 4  ;;  %s98_s9 = smov [#allocation2]   ;;  %s14_s8 = int_to_ptr.hbm [resolvable:$true] %s13_s8 }
   0x2   :  { %s15_s10 = sshll.u32 %s98_s9, 4  ;;  %s16_s10 = int_to_ptr.vmem [resolvable:$true] %s15_s10 }
   0x3   :  { %18 = dma.hbm_to_vmem [thread:$0]  %s14_s8, 256, %s16_s10, [#allocation3]  }
   0x4   :  { %94 = dma.done.wait [#allocation3], 256  }
   0x5   :  { %95 = vsyncadd [#allocation3], 4294967040  ;;  %s99_s11 = smov [#allocation5]   ;;  %s34_s15 = sshll.u32 %s117_s1, 4  ;;  %v23_v0 = vld [vmem:[#allocation2] sm:$0xff]  ;;  %v24_v1 = vld [vmem:[#allocation2 + $0x8] sm:$0xff]  ;;  %s35_s15 = int_to_ptr.hbm [resolvable:$true] %s34_s15 }
   0x6   :  { %s32_s12 = sshll.u32 %s99_s11, 4  ;;  %25 = vst [vmem:[#allocation5] sm:$0xff] %v23_v0  ;;  %s33_s12 = int_to_ptr.vmem [resolvable:$true] %s32_s12 }
   0x7   :  { %26 = vst [vmem:[#allocation5 + $0x8] sm:$0xff] %v24_v1 }
   0x8   :  { %37 = dma.vmem_to_hbm [thread:$0]  %s33_s12, 256, %s35_s15, [#allocation4]  }
   0x9   :  { %96 = dma.done.wait [#allocation4], 256  }
   0xa   :  { %97 = vsyncadd [#allocation4], 4294967040 }
   0xb   :  { %42 = vsyncpa [#allocation3], 1 }
   0xc   :  { %43 = vsyncpa [#allocation4], 1 }

</bundles_post_ra>
